<compile_context>
chip_gen: v7x
topology: tpu7x:2x2x1
jax: 0.10.0
libtpu: 0.0.40
codegen_flags: <defaults>
</compile_context>

<pallas_src>
import functools

import jax
import jax.numpy as jnp
from jax.experimental import pallas as pl
from jax.experimental.pallas import tpu as pltpu


def _round_up(x, m):
    return (x + m - 1) // m * m


def _ffn_kernel(x_ref, g_ref, b_ref, w1_ref, b1_ref, w2_ref, b2_ref, o_ref,
                *, d_real, d_padded, compute_dtype):
    # x_ref: (TM, Dp) tokens x padded dim_in; padded lanes / rows are zero.
    x = x_ref[...].astype(jnp.float32)

    # Small params read once per step (hoisted broadcasts).
    g = g_ref[...].astype(jnp.float32)      # (1, Dp), zero on padded lanes
    bt = b_ref[...].astype(jnp.float32)     # (1, Dp)
    b1 = b1_ref[...].astype(jnp.float32)    # (1, Fp)
    b2 = b2_ref[...].astype(jnp.float32)    # (1, Dp)

    # LayerNorm over the real feature width only (biased variance, eps=1e-6).
    inv_d = jnp.float32(1.0 / d_real)
    mu = jnp.sum(x, axis=-1, keepdims=True) * inv_d
    xc = x - mu
    if d_real < d_padded:
        # Padded lanes of x are zero but (x - mu) is -mu there; mask so the
        # variance only sees the real features.  Skipped when D % 128 == 0.
        lane = jax.lax.broadcasted_iota(jnp.int32, x.shape, dimension=1)
        xc = jnp.where(lane < d_real, xc, 0.0)
    var = jnp.sum(xc * xc, axis=-1, keepdims=True) * inv_d
    xn = xc * jax.lax.rsqrt(var + 1e-6) * g + bt   # padded lanes -> 0 (g=bt=0)

    # w_1 (Dp, Fp): bf16 operands, f32 accumulation on the MXU; LeakyReLU(0.2).
    h = jnp.dot(xn.astype(compute_dtype), w1_ref[...],
                preferred_element_type=jnp.float32) + b1
    h = jnp.where(h > 0, h, jnp.float32(0.2) * h)

    # dropout_1: identity (eval mode)

    # w_2 (Fp, Dp): bf16 operands, f32 accumulation.
    out = jnp.dot(h.astype(compute_dtype), w2_ref[...],
                  preferred_element_type=jnp.float32) + b2

    # dropout_2: identity (eval mode)
    o_ref[...] = out.astype(o_ref.dtype)


@functools.partial(jax.jit, static_argnames=("compute_dtype", "tm_max"))
def feed_forward(x, gamma, beta, w1, b1, w2, b2,
                 *, compute_dtype=jnp.bfloat16, tm_max=256):
    """x: (B, S, D) float32. Weights stored as (in, out) so the kernel does x @ W."""
    B, S, D = x.shape
    F = w1.shape[1]
    M = B * S

    # Lane-dense feature dims (multiple of 128); sublane-aligned token tile.
    Dp = _round_up(D, 128)
    Fp = _round_up(F, 128)
    TM = min(tm_max, _round_up(M, 8))
    Mp = _round_up(M, TM)

    # Zero-pad: padded lanes carry gamma=beta=bias=0 and zero weight rows/cols,
    # so they contribute nothing and padded output lanes are exactly zero.
    x2d = jnp.pad(x.reshape(M, D), ((0, Mp - M), (0, Dp - D)))
    g2d = jnp.pad(gamma, (0, Dp - D)).reshape(1, Dp)
    bt2d = jnp.pad(beta, (0, Dp - D)).reshape(1, Dp)
    w1p = jnp.pad(w1, ((0, Dp - D), (0, Fp - F))).astype(compute_dtype)
    b1p = jnp.pad(b1, (0, Fp - F)).reshape(1, Fp)
    w2p = jnp.pad(w2, ((0, Fp - F), (0, Dp - D))).astype(compute_dtype)
    b2p = jnp.pad(b2, (0, Dp - D)).reshape(1, Dp)

    grid = (Mp // TM,)
    kernel = functools.partial(_ffn_kernel, d_real=D, d_padded=Dp,
                               compute_dtype=compute_dtype)

    out2d = pl.pallas_call(
        kernel,
        out_shape=jax.ShapeDtypeStruct((Mp, Dp), x.dtype),
        grid=grid,
        in_specs=[
            pl.BlockSpec((TM, Dp), lambda i: (i, 0)),   # x: tiled over tokens
            pl.BlockSpec((1, Dp), lambda i: (0, 0)),    # gamma (resident)
            pl.BlockSpec((1, Dp), lambda i: (0, 0)),    # beta
            pl.BlockSpec((Dp, Fp), lambda i: (0, 0)),   # w1 (resident)
            pl.BlockSpec((1, Fp), lambda i: (0, 0)),    # b1
            pl.BlockSpec((Fp, Dp), lambda i: (0, 0)),   # w2 (resident)
            pl.BlockSpec((1, Dp), lambda i: (0, 0)),    # b2
        ],
        out_specs=pl.BlockSpec((TM, Dp), lambda i: (i, 0)),
        compiler_params=pltpu.CompilerParams(
            dimension_semantics=("parallel",),
            vmem_limit_bytes=48 * 1024 * 1024,   # headroom for v7x's 64 MiB VMEM
        ),
    )(x2d, g2d, bt2d, w1p, b1p, w2p, b2p)

    return out2d[:M, :D].reshape(B, S, D)


def _reference(x, gamma, beta, w1, b1, w2, b2):
    mu = jnp.mean(x, axis=-1, keepdims=True)
    var = jnp.mean((x - mu) ** 2, axis=-1, keepdims=True)
    xn = (x - mu) / jnp.sqrt(var + 1e-6) * gamma + beta
    h = xn @ w1 + b1
    h = jnp.where(h > 0, h, 0.2 * h)
    return h @ w2 + b2


if __name__ == "__main__":
    # Small shapes consistent with the module: batch=2, seq=8, dim_in=32, dim_ff=64
    B, S, DIM_IN, DIM_FF = 2, 8, 32, 64

    key = jax.random.PRNGKey(0)
    k_x, k_w1, k_b1, k_w2, k_b2 = jax.random.split(key, 5)

    x = jax.random.normal(k_x, (B, S, DIM_IN), dtype=jnp.float32)

    # Deterministic parameter init (synthetic; shapes from nn.Linear / nn.LayerNorm)
    w1 = jax.random.normal(k_w1, (DIM_IN, DIM_FF), dtype=jnp.float32) * 0.05
    b1 = jax.random.normal(k_b1, (DIM_FF,), dtype=jnp.float32) * 0.05
    w2 = jax.random.normal(k_w2, (DIM_FF, DIM_IN), dtype=jnp.float32) * 0.05
    b2 = jax.random.normal(k_b2, (DIM_IN,), dtype=jnp.float32) * 0.05
    gamma = jnp.ones((DIM_IN,), dtype=jnp.float32)
    beta = jnp.zeros((DIM_IN,), dtype=jnp.float32)

    out = feed_forward(x, gamma, beta, w1, b1, w2, b2)
    out = jax.block_until_ready(out)

    ref = _reference(x, gamma, beta, w1, b1, w2, b2)
    assert out.shape == (B, S, DIM_IN)
    # bf16 matmul operands (f32 accumulation) -> slightly looser tolerance.
    assert jnp.allclose(out, ref, atol=2e-2, rtol=2e-2), "mismatch vs reference"

    print("KERNEL_OK")
</pallas_src>

<mosaic_0001>
module attributes {stable_mosaic.version = 11 : i64} {
  func.func @_ffn_kernel(%arg0: i32, %arg1: memref<16x128xf32, #tpu.memory_space<vmem>>, %arg2: memref<1x128xf32, #tpu.memory_space<vmem>>, %arg3: memref<1x128xf32, #tpu.memory_space<vmem>>, %arg4: memref<128x128xbf16, #tpu.memory_space<vmem>>, %arg5: memref<1x128xf32, #tpu.memory_space<vmem>>, %arg6: memref<128x128xbf16, #tpu.memory_space<vmem>>, %arg7: memref<1x128xf32, #tpu.memory_space<vmem>>, %arg8: memref<16x128xf32, #tpu.memory_space<vmem>>) attributes {dimension_semantics = [#tpu.dimension_semantics<parallel>], iteration_bounds = array<i64: 1>, scalar_prefetch = 0 : i64, scratch_operands = 0 : i64, tpu.core_type = #tpu.core_type<tc>, window_params = [{transform_indices = @transform_0, window_bounds = array<i64: 16, 128>}, {pipeline_mode = #tpu.pipeline_mode<synchronous>, transform_indices = @transform_1, window_bounds = array<i64: 1, 128>}, {pipeline_mode = #tpu.pipeline_mode<synchronous>, transform_indices = @transform_2, window_bounds = array<i64: 1, 128>}, {pipeline_mode = #tpu.pipeline_mode<synchronous>, transform_indices = @transform_3, window_bounds = array<i64: 128, 128>}, {pipeline_mode = #tpu.pipeline_mode<synchronous>, transform_indices = @transform_4, window_bounds = array<i64: 1, 128>}, {pipeline_mode = #tpu.pipeline_mode<synchronous>, transform_indices = @transform_5, window_bounds = array<i64: 128, 128>}, {pipeline_mode = #tpu.pipeline_mode<synchronous>, transform_indices = @transform_6, window_bounds = array<i64: 1, 128>}, {transform_indices = @transform_7, window_bounds = array<i64: 16, 128>}]} {
    %c0 = arith.constant 0 : index
    %c0_0 = arith.constant 0 : index
    %0 = vector.load %arg1[%c0, %c0_0] : memref<16x128xf32, #tpu.memory_space<vmem>>, vector<16x128xf32>
    %c0_1 = arith.constant 0 : index
    %c0_2 = arith.constant 0 : index
    %1 = vector.load %arg2[%c0_1, %c0_2] : memref<1x128xf32, #tpu.memory_space<vmem>>, vector<1x128xf32>
    %c0_3 = arith.constant 0 : index
    %c0_4 = arith.constant 0 : index
    %2 = vector.load %arg3[%c0_3, %c0_4] : memref<1x128xf32, #tpu.memory_space<vmem>>, vector<1x128xf32>
    %c0_5 = arith.constant 0 : index
    %c0_6 = arith.constant 0 : index
    %3 = vector.load %arg5[%c0_5, %c0_6] : memref<1x128xf32, #tpu.memory_space<vmem>>, vector<1x128xf32>
    %c0_7 = arith.constant 0 : index
    %c0_8 = arith.constant 0 : index
    %4 = vector.load %arg7[%c0_7, %c0_8] : memref<1x128xf32, #tpu.memory_space<vmem>>, vector<1x128xf32>
    %cst = arith.constant dense<0.000000e+00> : vector<16xf32>
    %5 = vector.multi_reduction <add>, %0, %cst [1] : vector<16x128xf32> to vector<16xf32>
    %6 = vector.shape_cast %5 : vector<16xf32> to vector<16x1xf32>
    %cst_9 = arith.constant 3.125000e-02 : f32
    %7 = vector.broadcast %cst_9 : f32 to vector<16x1xf32>
    %8 = arith.mulf %6, %7 : vector<16x1xf32>
    %9 = vector.broadcast %8 : vector<16x1xf32> to vector<16x128xf32>
    %10 = arith.subf %0, %9 : vector<16x128xf32>
    %11 = tpu.iota {dimensions = array<i32: 1>} : vector<16x128xi32>
    %c32_i32 = arith.constant 32 : i32
    %12 = vector.broadcast %c32_i32 : i32 to vector<16x128xi32>
    %13 = arith.cmpi slt, %11, %12 : vector<16x128xi32>
    %cst_10 = arith.constant 0.000000e+00 : f32
    %14 = vector.broadcast %cst_10 : f32 to vector<16x128xf32>
    %15 = arith.select %13, %10, %14 : vector<16x128xi1>, vector<16x128xf32>
    %16 = arith.mulf %15, %15 : vector<16x128xf32>
    %cst_11 = arith.constant dense<0.000000e+00> : vector<16xf32>
    %17 = vector.multi_reduction <add>, %16, %cst_11 [1] : vector<16x128xf32> to vector<16xf32>
    %18 = vector.shape_cast %17 : vector<16xf32> to vector<16x1xf32>
    %cst_12 = arith.constant 3.125000e-02 : f32
    %19 = vector.broadcast %cst_12 : f32 to vector<16x1xf32>
    %20 = arith.mulf %18, %19 : vector<16x1xf32>
    %cst_13 = arith.constant 9.99999997E-7 : f32
    %21 = vector.broadcast %cst_13 : f32 to vector<16x1xf32>
    %22 = arith.addf %20, %21 : vector<16x1xf32>
    %23 = math.rsqrt %22 : vector<16x1xf32>
    %24 = vector.broadcast %23 : vector<16x1xf32> to vector<16x128xf32>
    %25 = arith.mulf %15, %24 : vector<16x128xf32>
    %26 = vector.broadcast %1 : vector<1x128xf32> to vector<16x128xf32>
    %27 = arith.mulf %25, %26 : vector<16x128xf32>
    %28 = vector.broadcast %2 : vector<1x128xf32> to vector<16x128xf32>
    %29 = arith.addf %27, %28 : vector<16x128xf32>
    %30 = arith.truncf %29 : vector<16x128xf32> to vector<16x128xbf16>
    %c0_14 = arith.constant 0 : index
    %c0_15 = arith.constant 0 : index
    %31 = vector.load %arg4[%c0_14, %c0_15] : memref<128x128xbf16, #tpu.memory_space<vmem>>, vector<128x128xbf16>
    %cst_16 = arith.constant dense<0.000000e+00> : vector<16x128xf32>
    %32 = tpu.matmul %30, %31, %cst_16 {dimension_numbers = #tpu.dot_dimension_numbers<[1], [0], [0], [1], [0, 0, 1, 1], [], []>} : vector<16x128xbf16>, vector<128x128xbf16>, vector<16x128xf32> -> vector<16x128xf32>
    %33 = vector.broadcast %3 : vector<1x128xf32> to vector<16x128xf32>
    %34 = arith.addf %32, %33 : vector<16x128xf32>
    %cst_17 = arith.constant 0.000000e+00 : f32
    %35 = vector.broadcast %cst_17 : f32 to vector<16x128xf32>
    %36 = arith.cmpf ogt, %34, %35 : vector<16x128xf32>
    %cst_18 = arith.constant 2.000000e-01 : f32
    %37 = vector.broadcast %cst_18 : f32 to vector<16x128xf32>
    %38 = arith.mulf %37, %34 : vector<16x128xf32>
    %39 = arith.select %36, %34, %38 : vector<16x128xi1>, vector<16x128xf32>
    %40 = arith.truncf %39 : vector<16x128xf32> to vector<16x128xbf16>
    %c0_19 = arith.constant 0 : index
    %c0_20 = arith.constant 0 : index
    %41 = vector.load %arg6[%c0_19, %c0_20] : memref<128x128xbf16, #tpu.memory_space<vmem>>, vector<128x128xbf16>
    %cst_21 = arith.constant dense<0.000000e+00> : vector<16x128xf32>
    %42 = tpu.matmul %40, %41, %cst_21 {dimension_numbers = #tpu.dot_dimension_numbers<[1], [0], [0], [1], [0, 0, 1, 1], [], []>} : vector<16x128xbf16>, vector<128x128xbf16>, vector<16x128xf32> -> vector<16x128xf32>
    %43 = vector.broadcast %4 : vector<1x128xf32> to vector<16x128xf32>
    %44 = arith.addf %42, %43 : vector<16x128xf32>
    %c0_22 = arith.constant 0 : index
    %c0_23 = arith.constant 0 : index
    %45 = vector.load %arg8[%c0_22, %c0_23] : memref<16x128xf32, #tpu.memory_space<vmem>>, vector<16x128xf32>
    tpu.vector_store %arg8[%c0_22, %c0_23], %44 {strides = array<i32>} : memref<16x128xf32, #tpu.memory_space<vmem>>, vector<16x128xf32>,
    return
  }
  func.func @transform_0(%arg0: i32) -> (i32, i32) {
    %c0_i32 = arith.constant 0 : i32
    %c0_i32_0 = arith.constant 0 : i32
    return %arg0, %c0_i32 : i32, i32
  }
  func.func @transform_1(%arg0: i32) -> (i32, i32) {
    %c0_i32 = arith.constant 0 : i32
    %c0_i32_0 = arith.constant 0 : i32
    %c0_i32_1 = arith.constant 0 : i32
    return %c0_i32, %c0_i32_0 : i32, i32
  }
  func.func @transform_2(%arg0: i32) -> (i32, i32) {
    %c0_i32 = arith.constant 0 : i32
    %c0_i32_0 = arith.constant 0 : i32
    %c0_i32_1 = arith.constant 0 : i32
    return %c0_i32, %c0_i32_0 : i32, i32
  }
  func.func @transform_3(%arg0: i32) -> (i32, i32) {
    %c0_i32 = arith.constant 0 : i32
    %c0_i32_0 = arith.constant 0 : i32
    %c0_i32_1 = arith.constant 0 : i32
    return %c0_i32, %c0_i32_0 : i32, i32
  }
  func.func @transform_4(%arg0: i32) -> (i32, i32) {
    %c0_i32 = arith.constant 0 : i32
    %c0_i32_0 = arith.constant 0 : i32
    %c0_i32_1 = arith.constant 0 : i32
    return %c0_i32, %c0_i32_0 : i32, i32
  }
  func.func @transform_5(%arg0: i32) -> (i32, i32) {
    %c0_i32 = arith.constant 0 : i32
    %c0_i32_0 = arith.constant 0 : i32
    %c0_i32_1 = arith.constant 0 : i32
    return %c0_i32, %c0_i32_0 : i32, i32
  }
  func.func @transform_6(%arg0: i32) -> (i32, i32) {
    %c0_i32 = arith.constant 0 : i32
    %c0_i32_0 = arith.constant 0 : i32
    %c0_i32_1 = arith.constant 0 : i32
    return %c0_i32, %c0_i32_0 : i32, i32
  }
  func.func @transform_7(%arg0: i32) -> (i32, i32) {
    %c0_i32 = arith.constant 0 : i32
    %c0_i32_0 = arith.constant 0 : i32
    return %arg0, %c0_i32 : i32, i32
  }
}

</mosaic_0001>

<bundles_post_ra>
// kernel: feed_forward.1
= control target key start
LH: loop header
LB: loop body
LE: loop exit
PB: predicated region body
PF: predicated region fallthrough
CT: control target
= control target key end

     0   :  { %v412_v2 = vmov 0.0   ;;  %v41_v4 = vlaneseq  ;;  %vm413_vm1 = vmmov 0   ;;  %s544_s0 = inlined_call_operand.vmem [shape: f32[16,128], index: 0, kind: input, shape index: {}]   ;;  %s545_s3 = inlined_call_operand.vmem [shape: bf16[128,128], index: 3, kind: input, shape index: {}]   ;;  %s546_s5 = inlined_call_operand.vmem [shape: bf16[128,128], index: 5, kind: input, shape index: {}]   ;;  %s547_s1 = inlined_call_operand.vmem [shape: f32[1,128], index: 1, kind: input, shape index: {}]   ;;  %s548_s2 = inlined_call_operand.vmem [shape: f32[1,128], index: 2, kind: input, shape index: {}]   ;;  %s549_s4 = inlined_call_operand.vmem [shape: f32[1,128], index: 4, kind: input, shape index: {}]   ;;  %s550_s6 = inlined_call_operand.vmem [shape: f32[1,128], index: 6, kind: input, shape index: {}]   ;;  %s551_s7 = inlined_call_operand.vmem [shape: f32[16,128], index: 7, kind: output, shape index: {}]  }
   0x1   :  { %v27_v0 = vld [vmem:[%s544_s0] sm:$0xff]  ;;  %v28_v1 = vld [vmem:[%s544_s0 + $0x8] sm:$0xff]  ;;  %350 = vmatprep.subr.bf16.mxu0 %v412_v2  ;;  %370 = vmatprep.subr.bf16.mxu1 %v412_v2  ;;  %v394_v17 = vld [vmem:[%s545_s3 + $0x10] sm:$0xff]  }
   0x2   :  { %33 = vadd.xlane.f32.xlu0 %v27_v0  ;;  %v392_v3 = vld [vmem:[%s545_s3] sm:$0xff]   ;;  %v42_v5 = vand.u32 127, %v41_v4  ;;  %v393_v16 = vld [vmem:[%s545_s3 + $0x8] sm:$0xff]   ;;  %v395_v18 = vld [vmem:[%s545_s3 + $0x18] sm:$0xff]   ;;  %366 = vmatprep.mubr.msk.bf16.mxu0 %vm413_vm1, %v412_v2 }
   0x3   :  { %351 = vmatpush3.bf16.msra.mxu0 %v392_v3  ;;  %v396_v19 = vld [vmem:[%s545_s3 + $0x20] sm:$0xff]   ;;  %386 = vmatprep.mubr.msk.bf16.mxu1 %vm413_vm1, %v412_v2  ;;  %v397_v20 = vld [vmem:[%s545_s3 + $0x28] sm:$0xff]   ;;  %v398_v21 = vld [vmem:[%s545_s3 + $0x30] sm:$0xff]  }
   0x4   :  { %352 = vmatprep.subr.bf16.mxu0 %v412_v2  ;;  %vm43_vm0 = vcmp.lt.s32.totalorder %v42_v5, 32  ;;  %v399_v22 = vld [vmem:[%s545_s3 + $0x38] sm:$0xff]   ;;  %v400_v23 = vld [vmem:[%s546_s5] sm:$0xff]   ;;  %v401_v24 = vld [vmem:[%s546_s5 + $0x8] sm:$0xff]  }
   0x5   :  { %371 = vmatpush3.bf16.msra.mxu1 %v400_v23  ;;  %v402_v25 = vld [vmem:[%s546_s5 + $0x10] sm:$0xff]   ;;  %v403_v26 = vld [vmem:[%s546_s5 + $0x18] sm:$0xff]   ;;  %v404_v27 = vld [vmem:[%s546_s5 + $0x20] sm:$0xff]  }
   0x6   :  { %35 = vadd.xlane.f32.xlu0 %v28_v1  ;;  %372 = vmatprep.subr.bf16.mxu1 %v412_v2  ;;  %v405_v28 = vld [vmem:[%s546_s5 + $0x28] sm:$0xff]   ;;  %v312_v37 = vld [vmem:[%s547_s1] ss:$0 sm:$0xff]  ;;  %v406_v46 = vld [vmem:[%s546_s5 + $0x30] sm:$0xff]  }
   0x7   :  { %353 = vmatpush3.bf16.msra.mxu0 %v393_v16  ;;  %v313_v41 = vld [vmem:[%s548_s2] ss:$0 sm:$0xff]  ;;  %v407_v47 = vld [vmem:[%s546_s5 + $0x38] sm:$0xff]  }
   0x8   :  { %354 = vmatprep.subr.bf16.mxu0 %v412_v2  ;;  %v314_v48 = vld [vmem:[%s549_s4] ss:$0 sm:$0xff] }
   0x9   :  { %373 = vmatpush3.bf16.msra.mxu1 %v401_v24  ;;  %v323_v60 = vld [vmem:[%s550_s6] ss:$0 sm:$0xff] }
   0xa   :  { %374 = vmatprep.subr.bf16.mxu1 %v412_v2 }
   0xb   :  { %355 = vmatpush3.bf16.msra.mxu0 %v394_v17 }
   0xc   :  { %356 = vmatprep.subr.bf16.mxu0 %v412_v2 }
   0xd   :  { %375 = vmatpush3.bf16.msra.mxu1 %v402_v25 }
   0xe   :  { %376 = vmatprep.subr.bf16.mxu1 %v412_v2 }
   0xf   :  { %357 = vmatpush3.bf16.msra.mxu0 %v395_v18 }
  0x10   :  { %358 = vmatprep.subr.bf16.mxu0 %v412_v2 }
  0x11   :  { %377 = vmatpush3.bf16.msra.mxu1 %v403_v26 }
  0x12   :  { %378 = vmatprep.subr.bf16.mxu1 %v412_v2 }
  0x13   :  { %359 = vmatpush3.bf16.msra.mxu0 %v396_v19 }
  0x14   :  { %360 = vmatprep.subr.bf16.mxu0 %v412_v2 }
  0x15   :  { %379 = vmatpush3.bf16.msra.mxu1 %v404_v27 }
  0x16   :  { %380 = vmatprep.subr.bf16.mxu1 %v412_v2 }
  0x17   :  { %361 = vmatpush3.bf16.msra.mxu0 %v397_v20 }
  0x18   :  { %362 = vmatprep.subr.bf16.mxu0 %v412_v2 }
  0x19   :  { %381 = vmatpush3.bf16.msra.mxu1 %v405_v28 }
  0x1a   :  { %382 = vmatprep.subr.bf16.mxu1 %v412_v2 }
  0x1b   :  { %363 = vmatpush3.bf16.msra.mxu0 %v398_v21 }
  0x1c   :  { %364 = vmatprep.subr.bf16.mxu0 %v412_v2 }
  0x1d   :  { %383 = vmatpush3.bf16.msra.mxu1 %v406_v46 }
  0x1e   :  { %384 = vmatprep.subr.bf16.mxu1 %v412_v2 }
  0x1f   :  { %365 = vmatpush3.bf16.msra.mxu0 %v399_v22 }
  0x21   :  { %385 = vmatpush3.bf16.msra.mxu1 %v407_v47 }
  0x8f   :  { %v34_v6 = vpop.xlane.xlu0 %33 }
  0x90   :  { %v37_v7 = vmul.f32 0.03125, %v34_v6 }
  0x92   :  { %v39_v8 = vsub.f32 %v27_v0, %v37_v7 }
  0x93   :  { %v36_v9 = vpop.xlane.xlu0 %35 }
  0x94   :  { %v38_v10 = vmul.f32 0.03125, %v36_v9  ;;  %v44_v11 = vsel %vm43_vm0, %v39_v8, 0.0 }
  0x95   :  { %v46_v12 = vmul.f32 %v44_v11, %v44_v11 }
  0x96   :  { %v40_v13 = vsub.f32 %v28_v1, %v38_v10 }
  0x97   :  { %48 = vadd.xlane.f32.xlu1 %v46_v12 }
  0x98   :  { %v45_v14 = vsel %vm43_vm0, %v40_v13, 0.0 }
  0x99   :  { %v47_v15 = vmul.f32 %v45_v14, %v45_v14 }
  0x9b   :  { %50 = vadd.xlane.f32.xlu1 %v47_v15 }
 0x124   :  { %v49_v29 = vpop.xlane.xlu1 %48 }
 0x125   :  { %v52_v30 = vmul.f32 0.03125, %v49_v29 }
 0x127   :  { %v54_v31 = vadd.f32 1e-06, %v52_v30 }
 0x128   :  { %v51_v32 = vpop.xlane.xlu1 %50 }
 0x129   :  { %408 = vrsqrt.f32 %v54_v31  ;;  %v53_v33 = vmul.f32 0.03125, %v51_v32 }
 0x12b   :  { %v55_v34 = vadd.f32 1e-06, %v53_v33 }
 0x12d   :  { %410 = vrsqrt.f32 %v55_v34 }
 0x133   :  { %v409_v35 = vpop.eup %408 }
 0x134   :  { %v58_v36 = vmul.f32 %v409_v35, %v44_v11 }
 0x136   :  { %v66_v40 = vmul.f32 %v312_v37, %v58_v36 }
 0x137   :  { %v411_v38 = vpop.eup %410 }
 0x138   :  { %v59_v39 = vmul.f32 %v411_v38, %v45_v14  ;;  %v74_v43 = vadd.f32 %v313_v41, %v66_v40 }
 0x13a   :  { %v67_v42 = vmul.f32 %v312_v37, %v59_v39 }
 0x13c   :  { %v75_v44 = vadd.f32 %v313_v41, %v67_v42 }
 0x13e   :  { %v76_v45 = vpack.c.bf16 %v75_v44, %v74_v43 }
 0x140   :  { %367 = vmatmul.mubr.bf16.vlgmr.msra.gmra.mrb[0].mxu0 %v76_v45 }
 0x213   :  { %v181_v49 = vpop.f32.mrb[0].mxu0 }
 0x214   :  { %v182_v50 = vadd.f32 %v314_v48, %v181_v49  ;;  %v368_v51 = vpop.f32.mrb[1].mxu0 }
 0x215   :  { %v184_v52 = vpop.f32.mrb[2].mxu0 }
 0x216   :  { %v190_v53 = vmul.f32 0.2, %v182_v50  ;;  %v185_v54 = vadd.f32 %v314_v48, %v184_v52  ;;  %v369_v55 = vpop.f32.mrb[3].mxu0  ;;  %vm188_vm2 = vcmp.gt.f32.partialorder %v182_v50, 0.0 }
 0x218   :  { %vm189_vm3 = vcmp.gt.f32.partialorder %v185_v54, 0.0  ;;  %v191_v56 = vmul.f32 0.2, %v185_v54  ;;  %v192_v57 = vsel %vm188_vm2, %v182_v50, %v190_v53 }
 0x21a   :  { %v193_v58 = vsel %vm189_vm3, %v185_v54, %v191_v56 }
 0x21b   :  { %v194_v59 = vpack.c.bf16 %v193_v58, %v192_v57 }
 0x21d   :  { %387 = vmatmul.mubr.bf16.vlgmr.msra.gmra.mrb[0].mxu1 %v194_v59 }
 0x2f0   :  { %v299_v61 = vpop.f32.mrb[0].mxu1 }
 0x2f1   :  { %v300_v62 = vadd.f32 %v323_v60, %v299_v61  ;;  %v388_v63 = vpop.f32.mrb[1].mxu1 }
 0x2f2   :  { %v302_v0 = vpop.f32.mrb[2].mxu1 }
 0x2f3   :  { %306 = vst [vmem:[%s551_s7] sm:$0xff] %v300_v62  ;;  %v303_v1 = vadd.f32 %v323_v60, %v302_v0  ;;  %v389_v2 = vpop.f32.mrb[3].mxu1 }
 0x2f5   :  { %307 = vst [vmem:[%s551_s7 + $0x8] sm:$0xff] %v303_v1 }

</bundles_post_ra>
